<compile_context>
chip_gen: v5e
topology: v5e:2x2
jax: 0.10.0
libtpu: 0.0.40
codegen_flags: <defaults>
</compile_context>

<pallas_src>
import jax
import jax.numpy as jnp
from jax.experimental import pallas as pl
from jax.experimental.pallas import tpu as pltpu


def _round_up(x, m):
    return -(-x // m) * m


def _spectral_mix_kernel(x_ref, w_ref, o_ref):
    """out[b,o,m] = sum_i x[b,i,m] * w[i,o,m] (complex); m = lane axis, VPU FMAs.

    x_ref : (bb, 2*Cin, TM)   rows [0:Cin]  = Re(x_ft), [Cin:2Cin]  = Im(x_ft)
    w_ref : (Cin, 2*Cout, TM) cols [0:Cout] = Re(w),    [Cout:2Cout]= Im(w)
    o_ref : (bb, 2*Cout, TM)  rows [0:Cout] = Re(out),  [Cout:2Cout]= Im(out)
    """
    x = x_ref[...]
    w = w_ref[...]
    cin = w.shape[0]
    cout = w.shape[1] // 2
    wr = w[:, :cout, :]
    wi = w[:, cout:, :]

    def term(i):
        xr_i = x[:, i:i + 1, :]                  # (bb, 1, TM): bcast over Cout rows
        xi_i = x[:, cin + i:cin + i + 1, :]
        wr_i = wr[i:i + 1, :, :]                 # (1, Cout, TM): bcast over leading bb
        wi_i = wi[i:i + 1, :, :]
        return xr_i * wr_i - xi_i * wi_i, xr_i * wi_i + xi_i * wr_i

    acc_r, acc_i = term(0)
    for i in range(1, cin):                      # static unroll; Cin is small
        tr, ti = term(i)
        acc_r = acc_r + tr
        acc_i = acc_i + ti

    o_ref[:, :cout, :] = acc_r
    o_ref[:, cout:, :] = acc_i


def _choose_tiles(B, cin, cout, m_used, vmem_cap_bytes):
    """Pick (bb, tm, mp): batch block, mode-lane tile, padded mode extent."""
    cin2, cout2 = 2 * cin, 2 * cout
    mp128 = _round_up(m_used, 128)
    acc_budget = 256 << 10                       # bound live (bb, 2Cout, TM) f32 acc
    for lanes in (2048, 1024, 512, 256, 128):    # large tiles first (DMA efficiency,
        tm = min(lanes, mp128)                   #  fewer ~0.35us grid-step overheads)
        mp = _round_up(m_used, tm)               # pad Mp to the tile: no divisor trap
        bb = max(1, B // 2) if B >= 2 else 1     # >=2 batch steps for v7x megacore
        while bb > 1 and (B % bb != 0 or bb * cout2 * tm * 4 > acc_budget):
            bb -= 1
        tile_bytes = 4 * tm * (bb * cin2 + cin * cout2 + bb * cout2)
        if 2 * tile_bytes + (4 << 20) <= vmem_cap_bytes:   # double-buffered + headroom
            return bb, tm, mp
    return 1, 128, _round_up(m_used, 128)


def _vmem_cap_bytes():
    phys = 128 << 20
    try:
        info = pltpu.get_tpu_info()
        phys = int(getattr(info, "vmem_capacity_bytes", phys))
    except Exception:
        pass
    # Leave headroom for compiler-internal scratch; on v7x (64 MiB) this caps ~48 MiB,
    # on v5e/v6e (128 MiB) it allows >64 MiB when the budget calls for it.
    return min(phys * 3 // 4, 96 << 20)


def _spectral_mix_pallas(x_cat, w_cat, *, bb, tm, vmem_limit):
    """(B, 2Cin, Mp) x (Cin, 2Cout, Mp) -> (B, 2Cout, Mp), complex mix over Cin."""
    B, cin2, mp = x_cat.shape
    cin, cout2, _ = w_cat.shape
    grid = (mp // tm, B // bb)                   # mode outer, batch inner

    cost = pl.CostEstimate(
        flops=2 * B * cin2 * cout2 * mp,         # 8 real flops per complex MAC
        transcendentals=0,
        bytes_accessed=4 * mp * (B * cin2 + cin * cout2 + B * cout2))

    return pl.pallas_call(
        _spectral_mix_kernel,
        out_shape=jax.ShapeDtypeStruct((B, cout2, mp), jnp.float32),
        grid_spec=pltpu.PrefetchScalarGridSpec(
            num_scalar_prefetch=0,
            grid=grid,
            in_specs=[pl.BlockSpec((bb, cin2, tm), lambda m, b: (b, 0, m)),
                      pl.BlockSpec((cin, cout2, tm), lambda m, b: (0, 0, m))],
            out_specs=pl.BlockSpec((bb, cout2, tm), lambda m, b: (b, 0, m)),
        ),
        compiler_params=pltpu.CompilerParams(
            dimension_semantics=("parallel", "parallel"),
            vmem_limit_bytes=vmem_limit),
        cost_estimate=cost,
    )(x_cat, w_cat)


class SpectralConv2dPallas:
    """JAX/Pallas port of the PyTorch SpectralConv2d module."""

    def __init__(self, in_channels, out_channels, modes1, modes2, key):
        self.in_channels = in_channels
        self.out_channels = out_channels
        self.modes1 = modes1
        self.modes2 = modes2
        scale = 1.0 / (in_channels * out_channels)
        k1r, k1i, k2r, k2i = jax.random.split(key, 4)
        shape = (in_channels, out_channels, modes1, modes2)
        # torch.rand(..., dtype=torch.cfloat) draws U[0,1) for real and imag parts.
        self.weights1 = (scale * (jax.random.uniform(k1r, shape, jnp.float32)
                                  + 1j * jax.random.uniform(k1i, shape, jnp.float32))
                         ).astype(jnp.complex64)
        self.weights2 = (scale * (jax.random.uniform(k2r, shape, jnp.float32)
                                  + 1j * jax.random.uniform(k2i, shape, jnp.float32))
                         ).astype(jnp.complex64)

        # ---- precompute the kernel weight layout once (hoisted out of forward) ----
        M = modes1 * modes2
        self._m_used = 2 * M                                 # top + bottom corners
        w_all = jnp.concatenate(
            [self.weights1.reshape(in_channels, out_channels, M),
             self.weights2.reshape(in_channels, out_channels, M)], axis=-1)
        # Single [wr | wi] slab (Cin, 2Cout, 2M): each weight value streamed once.
        self._w_cat = jnp.concatenate(
            [jnp.real(w_all), jnp.imag(w_all)], axis=1).astype(jnp.float32)
        self._plan = None                                    # (B, bb, tm, mp, vmem, w_pad)

    def _get_plan(self, B):
        if self._plan is not None and self._plan[0] == B:
            return self._plan[1:]
        vmem_cap = _vmem_cap_bytes()
        bb, tm, mp = _choose_tiles(B, self.in_channels, self.out_channels,
                                   self._m_used, vmem_cap)
        cin2, cout2 = 2 * self.in_channels, 2 * self.out_channels
        tile_bytes = 4 * tm * (bb * cin2 + self.in_channels * cout2 + bb * cout2)
        vmem_limit = int(min(max(2 * tile_bytes + (8 << 20), 32 << 20), vmem_cap))
        w_pad = jnp.pad(self._w_cat, ((0, 0), (0, 0), (0, mp - self._m_used)))
        self._plan = (B, bb, tm, mp, vmem_limit, w_pad)
        return self._plan[1:]

    def __call__(self, x):
        # x: (B, Cin, H, W) float32  (NCHW, matching the PyTorch module)
        B, _, H, W = x.shape
        m1, m2 = self.modes1, self.modes2
        M = m1 * m2
        Cout = self.out_channels
        Wf = W // 2 + 1
        bb, tm, mp, vmem_limit, w_pad = self._get_plan(B)

        # TODO(synk): rfft2/irfft2 have no Pallas TPU equivalent; done in plain JAX.
        x_ft = jnp.fft.rfft2(x)                              # (B, Cin, H, Wf) c64

        # Mode-last re-layout: reshapes/concats only, no transposes.
        top = x_ft[:, :, :m1, :m2].reshape(B, self.in_channels, M)
        bot = x_ft[:, :, H - m1:, :m2].reshape(B, self.in_channels, M)
        x_all = jnp.concatenate([top, bot], axis=-1)         # (B, Cin, 2M) c64
        x_cat = jnp.concatenate([jnp.real(x_all), jnp.imag(x_all)],
                                axis=1).astype(jnp.float32)  # (B, 2Cin, 2M)
        x_cat = jnp.pad(x_cat, ((0, 0), (0, 0), (0, mp - self._m_used)))

        out_cat = _spectral_mix_pallas(x_cat, w_pad,
                                       bb=bb, tm=tm, vmem_limit=vmem_limit)

        out_c = (out_cat[:, :Cout, :self._m_used]
                 + 1j * out_cat[:, Cout:, :self._m_used]).astype(jnp.complex64)
        top_o = out_c[:, :, :M].reshape(B, Cout, m1, m2)
        bot_o = out_c[:, :, M:].reshape(B, Cout, m1, m2)

        out_ft = jnp.zeros((B, Cout, H, Wf), dtype=jnp.complex64)
        out_ft = out_ft.at[:, :, :m1, :m2].set(top_o)
        out_ft = out_ft.at[:, :, H - m1:, :m2].set(bot_o)
        return jnp.fft.irfft2(out_ft, s=(H, W))              # (B, Cout, H, W) f32


def _reference(x, w1, w2, modes1, modes2, out_channels):
    """Pure-JAX reference mirroring the PyTorch forward exactly."""
    B, _, H, W = x.shape
    x_ft = jnp.fft.rfft2(x)
    Wf = W // 2 + 1
    top = jnp.einsum('bixy,ioxy->boxy', x_ft[:, :, :modes1, :modes2], w1)
    bot = jnp.einsum('bixy,ioxy->boxy', x_ft[:, :, H - modes1:, :modes2], w2)
    out_ft = jnp.zeros((B, out_channels, H, Wf), dtype=jnp.complex64)
    out_ft = out_ft.at[:, :, :modes1, :modes2].set(top)
    out_ft = out_ft.at[:, :, H - modes1:, :modes2].set(bot)
    return jnp.fft.irfft2(out_ft, s=(H, W))


if __name__ == "__main__":
    key = jax.random.PRNGKey(0)
    k_w, k_x = jax.random.split(key)

    B, Cin, Cout, H, W = 2, 4, 4, 16, 16
    modes1, modes2 = 4, 4

    layer = SpectralConv2dPallas(Cin, Cout, modes1, modes2, k_w)
    x = jax.random.normal(k_x, (B, Cin, H, W), dtype=jnp.float32)

    y = layer(x)
    y = jax.block_until_ready(y)

    y_ref = _reference(x, layer.weights1, layer.weights2, modes1, modes2, Cout)
    y_ref = jax.block_until_ready(y_ref)

    assert y.shape == (B, Cout, H, W)
    assert y.dtype == jnp.float32
    assert jnp.allclose(y, y_ref, atol=1e-5, rtol=1e-5), "mismatch vs reference"

    print("KERNEL_OK")
</pallas_src>

<mosaic_0001>
module attributes {stable_mosaic.version = 11 : i64} {
  func.func @_spectral_mix_kernel(%arg0: i32, %arg1: i32, %arg2: memref<1x8x128xf32, #tpu.memory_space<vmem>>, %arg3: memref<4x8x128xf32, #tpu.memory_space<vmem>>, %arg4: memref<1x8x128xf32, #tpu.memory_space<vmem>>) attributes {dimension_semantics = [#tpu.dimension_semantics<parallel>, #tpu.dimension_semantics<parallel>], iteration_bounds = array<i64: 1, 2>, scalar_prefetch = 0 : i64, scratch_operands = 0 : i64, tpu.core_type = #tpu.core_type<tc>, window_params = [{transform_indices = @transform_0, window_bounds = array<i64: 1, 8, 128>}, {transform_indices = @transform_1, window_bounds = array<i64: 4, 8, 128>}, {transform_indices = @transform_2, window_bounds = array<i64: 1, 8, 128>}]} {
    %c0 = arith.constant 0 : index
    %c0_0 = arith.constant 0 : index
    %c0_1 = arith.constant 0 : index
    %0 = vector.load %arg2[%c0, %c0_0, %c0_1] : memref<1x8x128xf32, #tpu.memory_space<vmem>>, vector<1x8x128xf32>
    %c0_2 = arith.constant 0 : index
    %c0_3 = arith.constant 0 : index
    %c0_4 = arith.constant 0 : index
    %1 = vector.load %arg3[%c0_2, %c0_3, %c0_4] : memref<4x8x128xf32, #tpu.memory_space<vmem>>, vector<4x8x128xf32>
    %2 = vector.extract_strided_slice %1 {offsets = [0, 0, 0], sizes = [4, 4, 128], strides = [1, 1, 1]} : vector<4x8x128xf32> to vector<4x4x128xf32>
    %3 = vector.extract_strided_slice %1 {offsets = [0, 4, 0], sizes = [4, 4, 128], strides = [1, 1, 1]} : vector<4x8x128xf32> to vector<4x4x128xf32>
    %4 = vector.extract_strided_slice %0 {offsets = [0, 0, 0], sizes = [1, 1, 128], strides = [1, 1, 1]} : vector<1x8x128xf32> to vector<1x1x128xf32>
    %5 = vector.extract_strided_slice %0 {offsets = [0, 4, 0], sizes = [1, 1, 128], strides = [1, 1, 1]} : vector<1x8x128xf32> to vector<1x1x128xf32>
    %6 = vector.extract_strided_slice %2 {offsets = [0, 0, 0], sizes = [1, 4, 128], strides = [1, 1, 1]} : vector<4x4x128xf32> to vector<1x4x128xf32>
    %7 = vector.extract_strided_slice %3 {offsets = [0, 0, 0], sizes = [1, 4, 128], strides = [1, 1, 1]} : vector<4x4x128xf32> to vector<1x4x128xf32>
    %8 = vector.broadcast %4 : vector<1x1x128xf32> to vector<1x4x128xf32>
    %9 = arith.mulf %8, %6 : vector<1x4x128xf32>
    %10 = vector.broadcast %5 : vector<1x1x128xf32> to vector<1x4x128xf32>
    %11 = arith.mulf %10, %7 : vector<1x4x128xf32>
    %12 = arith.subf %9, %11 : vector<1x4x128xf32>
    %13 = vector.broadcast %4 : vector<1x1x128xf32> to vector<1x4x128xf32>
    %14 = arith.mulf %13, %7 : vector<1x4x128xf32>
    %15 = vector.broadcast %5 : vector<1x1x128xf32> to vector<1x4x128xf32>
    %16 = arith.mulf %15, %6 : vector<1x4x128xf32>
    %17 = arith.addf %14, %16 : vector<1x4x128xf32>
    %18 = vector.extract_strided_slice %0 {offsets = [0, 1, 0], sizes = [1, 1, 128], strides = [1, 1, 1]} : vector<1x8x128xf32> to vector<1x1x128xf32>
    %19 = vector.extract_strided_slice %0 {offsets = [0, 5, 0], sizes = [1, 1, 128], strides = [1, 1, 1]} : vector<1x8x128xf32> to vector<1x1x128xf32>
    %20 = vector.extract_strided_slice %2 {offsets = [1, 0, 0], sizes = [1, 4, 128], strides = [1, 1, 1]} : vector<4x4x128xf32> to vector<1x4x128xf32>
    %21 = vector.extract_strided_slice %3 {offsets = [1, 0, 0], sizes = [1, 4, 128], strides = [1, 1, 1]} : vector<4x4x128xf32> to vector<1x4x128xf32>
    %22 = vector.broadcast %18 : vector<1x1x128xf32> to vector<1x4x128xf32>
    %23 = arith.mulf %22, %20 : vector<1x4x128xf32>
    %24 = vector.broadcast %19 : vector<1x1x128xf32> to vector<1x4x128xf32>
    %25 = arith.mulf %24, %21 : vector<1x4x128xf32>
    %26 = arith.subf %23, %25 : vector<1x4x128xf32>
    %27 = vector.broadcast %18 : vector<1x1x128xf32> to vector<1x4x128xf32>
    %28 = arith.mulf %27, %21 : vector<1x4x128xf32>
    %29 = vector.broadcast %19 : vector<1x1x128xf32> to vector<1x4x128xf32>
    %30 = arith.mulf %29, %20 : vector<1x4x128xf32>
    %31 = arith.addf %28, %30 : vector<1x4x128xf32>
    %32 = arith.addf %12, %26 : vector<1x4x128xf32>
    %33 = arith.addf %17, %31 : vector<1x4x128xf32>
    %34 = vector.extract_strided_slice %0 {offsets = [0, 2, 0], sizes = [1, 1, 128], strides = [1, 1, 1]} : vector<1x8x128xf32> to vector<1x1x128xf32>
    %35 = vector.extract_strided_slice %0 {offsets = [0, 6, 0], sizes = [1, 1, 128], strides = [1, 1, 1]} : vector<1x8x128xf32> to vector<1x1x128xf32>
    %36 = vector.extract_strided_slice %2 {offsets = [2, 0, 0], sizes = [1, 4, 128], strides = [1, 1, 1]} : vector<4x4x128xf32> to vector<1x4x128xf32>
    %37 = vector.extract_strided_slice %3 {offsets = [2, 0, 0], sizes = [1, 4, 128], strides = [1, 1, 1]} : vector<4x4x128xf32> to vector<1x4x128xf32>
    %38 = vector.broadcast %34 : vector<1x1x128xf32> to vector<1x4x128xf32>
    %39 = arith.mulf %38, %36 : vector<1x4x128xf32>
    %40 = vector.broadcast %35 : vector<1x1x128xf32> to vector<1x4x128xf32>
    %41 = arith.mulf %40, %37 : vector<1x4x128xf32>
    %42 = arith.subf %39, %41 : vector<1x4x128xf32>
    %43 = vector.broadcast %34 : vector<1x1x128xf32> to vector<1x4x128xf32>
    %44 = arith.mulf %43, %37 : vector<1x4x128xf32>
    %45 = vector.broadcast %35 : vector<1x1x128xf32> to vector<1x4x128xf32>
    %46 = arith.mulf %45, %36 : vector<1x4x128xf32>
    %47 = arith.addf %44, %46 : vector<1x4x128xf32>
    %48 = arith.addf %32, %42 : vector<1x4x128xf32>
    %49 = arith.addf %33, %47 : vector<1x4x128xf32>
    %50 = vector.extract_strided_slice %0 {offsets = [0, 3, 0], sizes = [1, 1, 128], strides = [1, 1, 1]} : vector<1x8x128xf32> to vector<1x1x128xf32>
    %51 = vector.extract_strided_slice %0 {offsets = [0, 7, 0], sizes = [1, 1, 128], strides = [1, 1, 1]} : vector<1x8x128xf32> to vector<1x1x128xf32>
    %52 = vector.extract_strided_slice %2 {offsets = [3, 0, 0], sizes = [1, 4, 128], strides = [1, 1, 1]} : vector<4x4x128xf32> to vector<1x4x128xf32>
    %53 = vector.extract_strided_slice %3 {offsets = [3, 0, 0], sizes = [1, 4, 128], strides = [1, 1, 1]} : vector<4x4x128xf32> to vector<1x4x128xf32>
    %54 = vector.broadcast %50 : vector<1x1x128xf32> to vector<1x4x128xf32>
    %55 = arith.mulf %54, %52 : vector<1x4x128xf32>
    %56 = vector.broadcast %51 : vector<1x1x128xf32> to vector<1x4x128xf32>
    %57 = arith.mulf %56, %53 : vector<1x4x128xf32>
    %58 = arith.subf %55, %57 : vector<1x4x128xf32>
    %59 = vector.broadcast %50 : vector<1x1x128xf32> to vector<1x4x128xf32>
    %60 = arith.mulf %59, %53 : vector<1x4x128xf32>
    %61 = vector.broadcast %51 : vector<1x1x128xf32> to vector<1x4x128xf32>
    %62 = arith.mulf %61, %52 : vector<1x4x128xf32>
    %63 = arith.addf %60, %62 : vector<1x4x128xf32>
    %64 = arith.addf %48, %58 : vector<1x4x128xf32>
    %65 = arith.addf %49, %63 : vector<1x4x128xf32>
    %c0_5 = arith.constant 0 : index
    %c0_6 = arith.constant 0 : index
    %c0_7 = arith.constant 0 : index
    %66 = vector.load %arg4[%c0_5, %c0_6, %c0_7] : memref<1x8x128xf32, #tpu.memory_space<vmem>>, vector<1x4x128xf32>
    tpu.vector_store %arg4[%c0_5, %c0_6, %c0_7], %64 {strides = array<i32>} : memref<1x8x128xf32, #tpu.memory_space<vmem>>, vector<1x4x128xf32>,
    %c0_8 = arith.constant 0 : index
    %c4 = arith.constant 4 : index
    %c0_9 = arith.constant 0 : index
    %67 = vector.load %arg4[%c0_8, %c4, %c0_9] : memref<1x8x128xf32, #tpu.memory_space<vmem>>, vector<1x4x128xf32>
    tpu.vector_store %arg4[%c0_8, %c4, %c0_9], %65 {strides = array<i32>} : memref<1x8x128xf32, #tpu.memory_space<vmem>>, vector<1x4x128xf32>,
    return
  }
  func.func @transform_0(%arg0: i32, %arg1: i32) -> (i32, i32, i32) {
    %c0_i32 = arith.constant 0 : i32
    %c0_i32_0 = arith.constant 0 : i32
    return %arg1, %c0_i32, %arg0 : i32, i32, i32
  }
  func.func @transform_1(%arg0: i32, %arg1: i32) -> (i32, i32, i32) {
    %c0_i32 = arith.constant 0 : i32
    %c0_i32_0 = arith.constant 0 : i32
    %c0_i32_1 = arith.constant 0 : i32
    return %c0_i32, %c0_i32_0, %arg0 : i32, i32, i32
  }
  func.func @transform_2(%arg0: i32, %arg1: i32) -> (i32, i32, i32) {
    %c0_i32 = arith.constant 0 : i32
    %c0_i32_0 = arith.constant 0 : i32
    return %arg1, %c0_i32, %arg0 : i32, i32, i32
  }
}

</mosaic_0001>

<bundles_post_ra>
// kernel: tpu_custom_call.1
= control target key start
LH: loop header
LB: loop body
LE: loop exit
PB: predicated region body
PF: predicated region fallthrough
CT: control target
= control target key end

     0   :  { %7 = vsyncpa [#allocation3], 0  ;;  %s763_s0 = inlined_call_operand.hbm [shape: f32[2,8,128], index: 0, kind: input, shape index: {}]   ;;  %s764_s1 = inlined_call_operand.hbm [shape: f32[4,8,128], index: 1, kind: input, shape index: {}]   ;;  %s765_s2 = inlined_call_operand.hbm [shape: f32[2,8,128], index: 2, kind: output, shape index: {}]  }
   0x1   :  { %9 = vsyncpa [#allocation3 + $0x1], 0 }
   0x2   :  { %10 = vsyncpa [#allocation6], 0 }
   0x3   :  { %11 = vsyncpa [#allocation4], 0 }
   0x4   :  { %13 = vsyncpa [#allocation4 + $0x1], 0  ;;  %s616_s9 = smov 0   ;;  %s618_s10 = smov 0  }
   0x5   :  { %s620_s11 = smov 0   ;;  %s622_s12 = smov 0  }
   0x6   :  { %s624_s13 = smov 0   ;;  %s626_s14 = smov 0  }
   0x7 LB: > { %s360_s15 = sadd.s32 4294967295, %s596_s14   ;;  %p362_p0 = scmp.ge.s32.totalorder %s596_s14, 1  ;;  %s596_s14 = sphi %s626_s14, %s19_s14   ;;  %s592_s13 = sphi %s624_s13, %s776_s13   ;;  %s588_s12 = sphi %s622_s12, %s775_s12   ;;  %s584_s11 = sphi %s620_s11, %s774_s11   ;;  %s580_s10 = sphi %s618_s10, %s773_s10   ;;  %s576_s9 = sphi %s616_s9, %s772_s9  }
   0x8   : > { %p648_p1 = scmp.eq.s32.totalorder %s360_s15, 0  ;;  %p118_p2 = scmp.lt.s32.totalorder %s596_s14, 3 }
   0x9   : > { %s131_s19 = sshll.u32 %s764_s1, 4  ;;  %s598_s21 = smov [#allocation5]   ;;  %s132_s19 = int_to_ptr.hbm [resolvable:$true] %s131_s19 }
   0xa   : > { %p656_p3 = pnand %p362_p0, %p118_p2  ;;  %s133_s22 = sshll.u32 %s598_s21, 4  ;;  %s134_s22 = int_to_ptr.vmem [resolvable:$true] %s133_s22 }
   0xb   : > { %p364_p6 = scmp.ge.s32.totalorder %s596_s14, 2  ;;  %s599_s23 = smov 128  }
   0xc   : > { %p383_p4 = pneg %p656_p3  ;;  %s600_s24 = smov 8  }
   0xd   : > { %s361_s25 = sadd.s32 4294967294, %s596_s14   ;;  %s28_s26 = sadd.s32 1, %s592_s13 }
   0xe   : > { %p384_p5 = pnand %p383_p4, %p648_p1  ;;  %s40_s27 = sadd.s32 1, %s584_s11 }
   0xf   : > { %p29_p7 = scmp.ge.s32.totalorder %s28_s26, 2  ;;  %p47_p8 = scmp.ne.s32.totalorder %s584_s11, %s580_s10 }
  0x10   : > { %386 = dma.hbm_to_vmem [thread:$0]  (!%p384_p5), %s132_s19, 512, %s134_s22, [#allocation6], %s599_s23, %s599_s23, %s600_s24  }
  0x11   : > { %p48_p9 = scmp.eq.s32.totalorder %s596_s14, 0  ;;  %p53_p10 = scmp.ne.s32.totalorder %s580_s10, %s576_s9 }
  0x12   : > { %s778_s26 = smov (%p29_p7, %s28_s26), 0  ;;  %p105_p13 = scmp.eq.s32.totalorder %s360_s15, 1 }
  0x13   : > { %p675_p11 = por %p48_p9, %p47_p8  ;;  %p681_p12 = por %p648_p1, %p53_p10 }
  0x14   : > { %s35_s30 = ssub.s32 %s592_s13, %s778_s26  ;;  %p111_p2 = scmp.eq.s32.totalorder %s361_s25, 1 }
  0x15   : > { %p38_p0 = scmp.eq.s32.totalorder %s35_s30, 0  ;;  %p687_p4 = por %p105_p13, %p47_p8 }
  0x16   : > { %p396_p5 = scmp.lt.s32.totalorder %s596_s14, 2  ;;  %p695_p7 = por %p111_p2, %p53_p10 }
  0x17   : > { %s693_s4 = scalar_select %p38_p0, %s584_s11, %s40_s27  }
  0x18   : > { %s147_s6 = sand.u32 1, %s584_s11   ;;  %s366_s8 = sshll.u32 %s592_s13, 3 }
  0x19   : > { %s365_s7 = sshll.u32 %s147_s6, 3  ;;  %s156_s15 = scalar_lea.hbm %s763_s0, %s366_s8 }
  0x1a   : > { %s151_s19 = scalar_lea.vmem [#allocation2], %s365_s7  ;;  %s158_s22 = sshll.u32 %s156_s15, 4  ;;  %s159_s22 = int_to_ptr.hbm [resolvable:$true] %s158_s22 }
  0x1b   : > { %s160_s21 = sshll.u32 %s151_s19, 4  ;;  %p388_p8 = pnand %p396_p5, %p675_p11  ;;  %s161_s21 = int_to_ptr.vmem [resolvable:$true] %s160_s21 }
  0x1c   : > { %s148_s23 = scalar_lea.sflag [#allocation3], %s147_s6  ;;  %169 = sbr.rel (%p656_p3) target bundleno = 56 (0x38), region = 28 }
  0x1d   : > { %390 = dma.hbm_to_vmem [thread:$0]  (!%p388_p8), %s159_s22, 128, %s161_s21, %s148_s23  }
  0x1e   : > { %s709_s24 = sand.u32 (!%p656_p3), 1, %s580_s10  }
  0x1f   : > { %s368_s25 = sshll.u32 (!%p656_p3), %s709_s24, 3  ;;  %s172_s27 = scalar_lea.sflag (!%p656_p3), [#allocation3], %s709_s24 }
  0x20   : > { %s175_s30 = scalar_lea.vmem (!%p656_p3), [#allocation2], %s368_s25 }
  0x21   : > { %563 = dma.done.wait (%p681_p12), %s172_s27, 128  }
  0x22   : > { %565 = vsyncadd (%p681_p12), %s172_s27, 4294967168 }
  0x23   : > { %567 = dma.done.wait (%p648_p1), [#allocation6], 512  }
  0x24   : > { %569 = vsyncadd (%p648_p1), [#allocation6], 4294966784  ;;  %v202_v0 = vld [vmem:[%s175_s30] sm:$0xff]  ;;  %v203_v1 = vld [vmem:[#allocation5] sm:$0xff]  ;;  %s372_s16 = sshll.u32 %s588_s12, 3  ;;  %s201_s12 = scalar_lea.vmem [#allocation7], %s368_s25 }
  0x25   : > { %v204_v2 = vld [vmem:[#allocation5 + $0x8] sm:$0xff]  ;;  %v205_v3 = vld [vmem:[#allocation5 + $0x10] sm:$0xff]  ;;  %v206_v4 = vld [vmem:[#allocation5 + $0x18] sm:$0xff]  ;;  %v207_v5 = vperm.slane %v202_v0, 0  ;;  %v209_v6 = vperm.slane %v202_v0, 4  ;;  %v216_v7 = vperm.slane %v202_v0, 1  ;;  %s263_s29 = scalar_lea.hbm %s765_s2, %s372_s16 }
  0x26   : > { %v218_v8 = vperm.slane %v202_v0, 5  ;;  %v227_v9 = vperm.slane %v202_v0, 2  ;;  %v229_v10 = vperm.slane %v202_v0, 6  ;;  %v238_v11 = vperm.slane %v202_v0, 3  ;;  %s265_s6 = sshll.u32 %s201_s12, 4  ;;  %s267_s7 = sshll.u32 %s263_s29, 4  ;;  %s266_s6 = int_to_ptr.vmem [resolvable:$true] %s265_s6  ;;  %s268_s7 = int_to_ptr.hbm [resolvable:$true] %s267_s7 }
  0x27   : > { %v240_v12 = vperm.slane %v202_v0, 7  ;;  %v208_v13 = vmul.f32 %v207_v5, %v203_v1  ;;  %v210_v14 = vmul.f32 %v209_v6, %v203_v1  ;;  %v217_v15 = vmul.f32 %v216_v7, %v204_v2  ;;  %s252_s8 = scalar_lea.sflag [#allocation4], %s709_s24  ;;  %s524_s17 = sshra.s32 %s268_s7, 4  ;;  %s525_s17 = int_to_ptr.hbm [resolvable:$true] %s524_s17 }
  0x28   : > { %v219_v16 = vmul.f32 %v218_v8, %v204_v2  ;;  %v228_v17 = vmul.f32 %v227_v9, %v205_v3  ;;  %v230_v18 = vmul.f32 %v229_v10, %v205_v3  ;;  %v239_v22 = vmul.f32 %v238_v11, %v206_v4  ;;  %s526_s18 = scalar_lea.hbm %s525_s17, 8  ;;  %s530_s21 = scalar_lea.hbm %s765_s2, 16 }
  0x29   : > { %v241_v19 = vmul.f32 %v240_v12, %v206_v4  ;;  %v212_v20 = vrot.slane %v210_v14, 4  ;;  %p527_p1 = scmp.ne.s32.totalorder %s525_s17, %s526_s18  ;;  %p531_p10 = scmp.lt.s32.totalorder %s525_s17, %s765_s2 }
  0x2a   : > { %v221_v21 = vrot.slane %v219_v16, 4  ;;  %v232_v23 = vrot.slane %v230_v18, 4  ;;  %p532_p11 = scmp.lt.s32.totalorder %s530_s21, %s526_s18 }
  0x2b   : > { %v243_v24 = vrot.slane %v241_v19, 4  ;;  %v214_v25 = vsub.f32 %v208_v13, %v212_v20  ;;  %v215_v27 = vadd.f32 %v212_v20, %v208_v13  ;;  %p528_p3 = pnand %p527_p1, %p687_p4 }
  0x2c   : > { %v223_v26 = vsub.f32 %v217_v15, %v221_v21  ;;  %v224_v28 = vadd.f32 %v221_v21, %v217_v15  ;;  %v234_v29 = vsub.f32 %v228_v17, %v232_v23  ;;  %v235_v30 = vadd.f32 %v232_v23, %v228_v17  ;;  %p533_p12 = por %p532_p11, %p531_p10 }
  0x2d   : > { %v245_v32 = vsub.f32 %v239_v22, %v243_v24  ;;  %v246_v34 = vadd.f32 %v243_v24, %v239_v22  ;;  %p529_p9 = pneg %p528_p3 }
  0x2e   : > { %v225_v31 = vadd.f32 %v223_v26, %v214_v25  ;;  %v226_v33 = vadd.f32 %v224_v28, %v215_v27 }
  0x2f   : > { %p534_p13 = pnand %p533_p12, %p529_p9 }
  0x30   : > { %v236_v35 = vadd.f32 %v234_v29, %v225_v31  ;;  %v237_v36 = vadd.f32 %v235_v30, %v226_v33 }
  0x32   : > { %v247_v37 = vadd.f32 %v245_v32, %v236_v35  ;;  %v248_v38 = vadd.f32 %v246_v34, %v237_v36 }
  0x34   : > { %249 = vst [vmem:[%s201_s12] sm:$0xf] %v247_v37 }
  0x35   : > { %250 = vst [vmem:[%s201_s12] sm:$0xf0] %v248_v38 }
  0x36   : > { %537 = shalt.err (!%p534_p13)
}
  0x37   : > { %381 = dma.vmem_to_hbm [thread:$0]  (%p687_p4), %s266_s6, 128, %s268_s7, %s252_s8  }
  0x38 PF: > { %s279_s24 = sand.u32 1, %s576_s9   ;;  %p392_p0 = pnand %p364_p6, %p695_p7 }
  0x39   : > { %s280_s25 = scalar_lea.sflag [#allocation4], %s279_s24 }
  0x3a   : > { %p393_p2 = pneg %p392_p0 }
  0x3c   : > { %571 = dma.done.wait (%p393_p2), %s280_s25, 128  }
  0x3d   : > { %573 = vsyncadd (%p393_p2), %s280_s25, 4294967168  ;;  %s19_s14 = sadd.s32 1, %s596_s14   ;;  %s772_s9 = smov %s580_s10 }
  0x3e   : > { %p16_p5 = scmp.ge.s32.totalorder %s19_s14, 4   ;;  %s773_s10 = smov %s584_s11 }
  0x3f   : > { %s774_s11 = smov %s693_s4  ;;  %s775_s12 = smov %s592_s13 }
  0x40   : > { %s776_s13 = smov %s778_s26  ;;  %18 = sbr.rel (!%p16_p5) target bundleno = 7 (0x7), region = 78 }
  0x45   :  { %286 = vsyncpa [#allocation3], 1 }
  0x46   :  { %288 = vsyncpa [#allocation3 + $0x1], 1 }
  0x47   :  { %289 = vsyncpa [#allocation6], 1 }
  0x48   :  { %290 = vsyncpa [#allocation4], 1 }
  0x49   :  { %292 = vsyncpa [#allocation4 + $0x1], 1 }

</bundles_post_ra>
